<compile_context>
chip_gen: v7x
topology: tpu7x:2x2x1
jax: 0.10.0
libtpu: 0.0.40
codegen_flags: <defaults>
</compile_context>

<pallas_src>
import math

import jax
import jax.numpy as jnp
from jax.experimental import pallas as pl
from jax.experimental.pallas import tpu as pltpu


# ----------------------------------------------------------------------------- PE table
def _build_pe(d_model: int, max_seq_length: int = 5000) -> jnp.ndarray:
    """Sinusoidal positional-encoding table, shape (1, max_seq, d_model), float32."""
    position = jnp.arange(max_seq_length, dtype=jnp.float32)[:, None]              # (L, 1)
    div_term = jnp.exp(
        jnp.arange(0, d_model, 2, dtype=jnp.float32) * (-math.log(10000.0) / d_model)
    )                                                                               # (ceil(D/2),)
    angles = position * div_term                                                    # (L, ceil(D/2))
    pe = jnp.zeros((max_seq_length, d_model), dtype=jnp.float32)
    pe = pe.at[:, 0::2].set(jnp.sin(angles))
    pe = pe.at[:, 1::2].set(jnp.cos(angles[:, : d_model // 2]))                     # odd-D safe
    return pe[None]                                                                 # (1, L, D)


# ----------------------------------------------------------------------------- kernel
def _add_pe_kernel(x_ref, pe_ref, o_ref):
    # Pure VPU elementwise add; pe block broadcasts over the leading (batch) dim.
    o_ref[...] = (x_ref[...] + pe_ref[...]).astype(o_ref.dtype)


# ----------------------------------------------------------------------------- sizing
def _budgets():
    """(per-block byte target, scoped-VMEM limit) — safe on v5e/v6e/v7x."""
    target = 4 * 1024 * 1024          # ~4 MiB blocks (amortizes per-step overhead)
    limit = 48 * 1024 * 1024          # 6 double-buffered blocks << 48 MiB << 64 MiB (v7x)
    try:
        vmem = getattr(pltpu.get_tpu_info(), "vmem_capacity_bytes", None)
        if vmem:
            limit = min(limit, (int(vmem) * 3) // 4)   # never exceed 3/4 of physical VMEM
    except Exception:
        pass
    return target, limit


def _round_up(x: int, m: int) -> int:
    return -(-x // m) * m


# ----------------------------------------------------------------------------- 3D path
def _add_pe_3d(x3: jnp.ndarray, pe3: jnp.ndarray, target_bytes: int, vmem_limit: int):
    """x3: (B, S, D) with D % 128 == 0; pe3: (1, L>=~S, D) same dtype as x3."""
    B, S, D = x3.shape
    itemsize = jnp.dtype(x3.dtype).itemsize
    sublane = 8 if itemsize >= 4 else 8 * (4 // itemsize)        # 8 f32, 16 bf16

    # Rows per block sized to ~target bytes, sublane-aligned (cdiv handles remainder).
    rows_budget = max(1, target_bytes // (D * itemsize))
    tS = min(_round_up(S, sublane),
             max(sublane, (rows_budget // sublane) * sublane))
    # Fold batch rows into the x/out block if a single tS-slab is well under budget
    # (fewer grid steps / DMA descriptors); keep pe at a single broadcast slab.
    bB = max(1, min(B, target_bytes // (tS * D * itemsize)))
    while B % bB != 0:                                           # keep batch blocks exact
        bB -= 1

    grid = (pl.cdiv(S, tS), pl.cdiv(B, bB))                      # batch innermost -> pe resident
    return pl.pallas_call(
        _add_pe_kernel,
        out_shape=jax.ShapeDtypeStruct((B, S, D), x3.dtype),
        grid_spec=pl.GridSpec(
            grid=grid,
            in_specs=[
                pl.BlockSpec((bB, tS, D), lambda s, b: (b, s, 0)),   # x
                pl.BlockSpec((1, tS, D), lambda s, b: (0, s, 0)),    # pe (batch-invariant)
            ],
            out_specs=pl.BlockSpec((bB, tS, D), lambda s, b: (b, s, 0)),
        ),
        compiler_params=pltpu.CompilerParams(
            dimension_semantics=("parallel", "parallel"),
            vmem_limit_bytes=vmem_limit,
        ),
    )(x3, pe3)


# ----------------------------------------------------------------------------- wrapper
def positional_encoding_forward(x: jnp.ndarray, pe: jnp.ndarray) -> jnp.ndarray:
    """x: (B, S, D); pe: (1, max_seq, D) float32 table. Returns x + pe[:, :S]."""
    B, S, D = x.shape
    L = pe.shape[1]
    assert S <= L, "sequence longer than positional-encoding table"

    target_bytes, vmem_limit = _budgets()
    itemsize = jnp.dtype(x.dtype).itemsize

    if D % 128 == 0:
        # Lane dim already dense. Pass the full table when no cast is needed
        # (the grid only fetches rows < roundup(S)); slice only if we must cast.
        # TODO(synk): PyTorch promotes bf16 x + f32 pe -> f32; here the add is in x.dtype.
        pe_in = pe if pe.dtype == x.dtype else pe[:, :S, :].astype(x.dtype)
        return _add_pe_3d(x, pe_in, target_bytes, vmem_limit)

    # D not lane-aligned: a contiguous (S, D) view of the table is needed anyway.
    pe_s = pe[:, :S, :]
    if pe_s.dtype != x.dtype:
        pe_s = pe_s.astype(x.dtype)

    F = S * D
    if F % 128 == 0:
        # Sublane-dense reshape: (B, S, D) -> (B, R, 128); reuse the 3D path so every
        # vreg sublane carries useful data even for small B.
        R = F // 128
        out = _add_pe_3d(x.reshape(B, R, 128), pe_s.reshape(1, R, 128),
                         target_bytes, vmem_limit)
        return out.reshape(B, S, D)

    # Fallback (S*D not a multiple of 128): flatten to the lane axis. The lane-tile
    # budget now accounts for B, so the (B, tF) block respects the VMEM limit.
    x2 = x.reshape(B, F)
    pe2 = pe_s.reshape(1, F)
    lane_budget = max(128, ((target_bytes // max(1, B * itemsize)) // 128) * 128)
    tF = min(_round_up(F, 128), lane_budget)
    grid = (pl.cdiv(F, tF),)
    out2 = pl.pallas_call(
        _add_pe_kernel,
        out_shape=jax.ShapeDtypeStruct((B, F), x.dtype),
        grid_spec=pl.GridSpec(
            grid=grid,
            in_specs=[
                pl.BlockSpec((B, tF), lambda f: (0, f)),     # x: all batches per tile
                pl.BlockSpec((1, tF), lambda f: (0, f)),     # pe: broadcast over batch
            ],
            out_specs=pl.BlockSpec((B, tF), lambda f: (0, f)),
        ),
        compiler_params=pltpu.CompilerParams(
            dimension_semantics=("parallel",),
            vmem_limit_bytes=vmem_limit,
        ),
    )(x2, pe2)
    return out2.reshape(B, S, D)


# ----------------------------------------------------------------------------- test
if __name__ == "__main__":
    key = jax.random.PRNGKey(0)
    max_seq_length = 64

    # Case 1: small d_model (< 128), S*D % 128 == 0 -> sublane-dense reshape path.
    b1, s1, d1 = 2, 8, 32
    x1 = jax.random.normal(key, (b1, s1, d1), dtype=jnp.float32)
    pe1 = _build_pe(d1, max_seq_length)
    out1 = jax.block_until_ready(positional_encoding_forward(x1, pe1))
    ref1 = x1 + pe1[:, :s1, :]
    assert out1.shape == (b1, s1, d1)
    assert jnp.allclose(out1, ref1, atol=1e-6), "mismatch vs reference (reshape path)"

    # Case 2: d_model multiple of 128 -> tiled 3D path with resident PE tile.
    b2, s2, d2 = 2, 16, 128
    x2 = jax.random.normal(jax.random.PRNGKey(1), (b2, s2, d2), dtype=jnp.float32)
    pe2 = _build_pe(d2, max_seq_length)
    out2 = jax.block_until_ready(positional_encoding_forward(x2, pe2))
    ref2 = x2 + pe2[:, :s2, :]
    assert out2.shape == (b2, s2, d2)
    assert jnp.allclose(out2, ref2, atol=1e-6), "mismatch vs reference (3D path)"

    # Case 3: S*D not a multiple of 128 -> flattened fallback with masked last block.
    b3, s3, d3 = 2, 5, 24
    x3 = jax.random.normal(jax.random.PRNGKey(2), (b3, s3, d3), dtype=jnp.float32)
    pe3 = _build_pe(d3, max_seq_length)
    out3 = jax.block_until_ready(positional_encoding_forward(x3, pe3))
    ref3 = x3 + pe3[:, :s3, :]
    assert out3.shape == (b3, s3, d3)
    assert jnp.allclose(out3, ref3, atol=1e-6), "mismatch vs reference (fallback path)"

    print("KERNEL_OK")
</pallas_src>

<mosaic_0001>
module attributes {stable_mosaic.version = 11 : i64} {
  func.func @_add_pe_kernel(%arg0: i32, %arg1: i32, %arg2: memref<2x8x128xf32, #tpu.memory_space<vmem>>, %arg3: memref<1x8x128xf32, #tpu.memory_space<vmem>>, %arg4: memref<2x8x128xf32, #tpu.memory_space<vmem>>) attributes {dimension_semantics = [#tpu.dimension_semantics<parallel>, #tpu.dimension_semantics<parallel>], iteration_bounds = array<i64: 1, 1>, scalar_prefetch = 0 : i64, scratch_operands = 0 : i64, tpu.core_type = #tpu.core_type<tc>, window_params = [{transform_indices = @transform_0, window_bounds = array<i64: 2, 8, 128>}, {transform_indices = @transform_1, window_bounds = array<i64: 1, 8, 128>}, {transform_indices = @transform_2, window_bounds = array<i64: 2, 8, 128>}]} {
    %c0 = arith.constant 0 : index
    %c0_0 = arith.constant 0 : index
    %c0_1 = arith.constant 0 : index
    %0 = vector.load %arg2[%c0, %c0_0, %c0_1] : memref<2x8x128xf32, #tpu.memory_space<vmem>>, vector<2x8x128xf32>
    %c0_2 = arith.constant 0 : index
    %c0_3 = arith.constant 0 : index
    %c0_4 = arith.constant 0 : index
    %1 = vector.load %arg3[%c0_2, %c0_3, %c0_4] : memref<1x8x128xf32, #tpu.memory_space<vmem>>, vector<1x8x128xf32>
    %2 = vector.broadcast %1 : vector<1x8x128xf32> to vector<2x8x128xf32>
    %3 = arith.addf %0, %2 : vector<2x8x128xf32>
    %c0_5 = arith.constant 0 : index
    %c0_6 = arith.constant 0 : index
    %c0_7 = arith.constant 0 : index
    %4 = vector.load %arg4[%c0_5, %c0_6, %c0_7] : memref<2x8x128xf32, #tpu.memory_space<vmem>>, vector<2x8x128xf32>
    tpu.vector_store %arg4[%c0_5, %c0_6, %c0_7], %3 {strides = array<i32>} : memref<2x8x128xf32, #tpu.memory_space<vmem>>, vector<2x8x128xf32>,
    return
  }
  func.func @transform_0(%arg0: i32, %arg1: i32) -> (i32, i32, i32) {
    %c0_i32 = arith.constant 0 : i32
    %c0_i32_0 = arith.constant 0 : i32
    return %arg1, %arg0, %c0_i32 : i32, i32, i32
  }
  func.func @transform_1(%arg0: i32, %arg1: i32) -> (i32, i32, i32) {
    %c0_i32 = arith.constant 0 : i32
    %c0_i32_0 = arith.constant 0 : i32
    %c0_i32_1 = arith.constant 0 : i32
    return %c0_i32, %arg0, %c0_i32_0 : i32, i32, i32
  }
  func.func @transform_2(%arg0: i32, %arg1: i32) -> (i32, i32, i32) {
    %c0_i32 = arith.constant 0 : i32
    %c0_i32_0 = arith.constant 0 : i32
    return %arg1, %arg0, %c0_i32 : i32, i32, i32
  }
}

</mosaic_0001>

<bundles_post_ra>
// kernel: tpu_custom_call.1
= control target key start
LH: loop header
LB: loop body
LE: loop exit
PB: predicated region body
PF: predicated region fallthrough
CT: control target
= control target key end

     0   :  { %7 = vsyncpa [#allocation3], 0  ;;  %s164_s0 = inlined_call_operand.hbm [shape: f32[2,2,128], index: 0, kind: input, shape index: {}]   ;;  %s165_s1 = inlined_call_operand.vmem [shape: f32[1,2,128], index: 1, kind: input, shape index: {}]   ;;  %s166_s2 = inlined_call_operand.hbm [shape: f32[2,2,128], index: 2, kind: output, shape index: {}]  }
   0x1   :  { %8 = vsyncpa [#allocation4], 0 }
   0x2   :  { %13 = vsyncadd [#allocation3], 192  ;;  %s18_s9 = sld [smem:[#allocation0]]   ;;  %s125_s10 = smov [#allocation2]  }
   0x3   :  { %s26_s11 = sshll.u32 %s125_s10, 4  ;;  %s126_s12 = smov 32   ;;  %s27_s11 = int_to_ptr.vmem [resolvable:$true] %s26_s11 }
   0x4   :  { %33 = sst [smem:[#allocation7]] %s126_s12  ;;  %s127_s13 = smov 128  }
   0x5   :  { %35 = sst [smem:[#allocation7 + $0x1]] %s127_s13  ;;  %s128_s14 = smov 1  }
   0x6   :  { %37 = sst [smem:[#allocation7 + $0x2]] %s128_s14  ;;  %s129_s17 = smov 2  }
   0x7   :  { %39 = sst [smem:[#allocation7 + $0x3]] %s126_s12  ;;  %s130_s18 = smov [#allocation3]  }
   0x8   :  { %s104_s15 = sshll.u32 %s18_s9, 26  ;;  %41 = sst [smem:[#allocation7 + $0x4]] %s126_s12 }
   0x9   :  { %s105_s16 = sadd.s32 134217728, %s104_s15  ;;  %43 = sst [smem:[#allocation7 + $0x5]] %s129_s17 }
   0xa   :  { %s131_s19 = smov [#allocation6]  }
   0xb   :  { %45 = dma.general %s164_s0, 64, %s27_s11, %s130_s18, %s131_s19, [#allocation7], %s105_s16, 0  }
   0xc   :  { %121 = dma.done.wait [#allocation3], 256  }
   0xd   :  { %122 = vsyncadd [#allocation3], 4294967040  ;;  %v51_v0 = vld [vmem:[#allocation2] sm:$0xff]  ;;  %v52_v2 = vld [vmem:[#allocation2 + $0x8] sm:$0xff] }
   0xe   :  { %v53_v1 = vld [vmem:[%s165_s1] sm:$0xff] }
   0xf   :  { %v54_v3 = vadd.f32 %v53_v1, %v51_v0  ;;  %v55_v4 = vadd.f32 %v53_v1, %v52_v2 }
  0x11   :  { %56 = vst [vmem:[#allocation5] sm:$0xff] %v54_v3  ;;  %57 = vst [vmem:[#allocation5 + $0x8] sm:$0xff] %v55_v4 }
  0x12   :  { %62 = vsyncadd [#allocation4], 192  ;;  %s132_s24 = smov [#allocation5]   ;;  %s133_s26 = smov 128  }
  0x13   :  { %s79_s25 = sshll.u32 %s132_s24, 4  ;;  %86 = sst [smem:[#allocation9]] %s133_s26  ;;  %s80_s25 = int_to_ptr.vmem [resolvable:$true] %s79_s25 }
  0x14   :  { %s134_s27 = smov 32   ;;  %s135_s0 = smov 1  }
  0x15   :  { %88 = sst [smem:[#allocation9 + $0x1]] %s134_s27  ;;  %s136_s28 = smov 2  }
  0x16   :  { %90 = sst [smem:[#allocation9 + $0x2]] %s135_s0  ;;  %s137_s1 = smov [#allocation4]  }
  0x17   :  { %92 = sst [smem:[#allocation9 + $0x3]] %s134_s27  ;;  %s138_s29 = smov [#allocation8]  }
  0x18   :  { %94 = sst [smem:[#allocation9 + $0x4]] %s134_s27  ;;  %s139_s30 = smov 0  }
  0x19   :  { %96 = sst [smem:[#allocation9 + $0x5]] %s136_s28 }
  0x1a   :  { %98 = dma.general %s80_s25, 64, %s166_s2, %s137_s1, %s138_s29, [#allocation9], %s139_s30, 0  }
  0x1b   :  { %123 = dma.done.wait [#allocation4], 256  }
  0x1c   :  { %124 = vsyncadd [#allocation4], 4294967040 }
  0x1d   :  { %102 = vsyncpa [#allocation3], 1 }
  0x1e   :  { %103 = vsyncpa [#allocation4], 1 }

</bundles_post_ra>
